<compile_context>
chip_gen: v7x
topology: tpu7x:2x2x1
jax: 0.10.0
libtpu: 0.0.40
codegen_flags: <defaults>
</compile_context>

<pallas_src>
import functools

import jax
import jax.numpy as jnp
from jax import lax
from jax.experimental import pallas as pl
from jax.experimental.pallas import tpu as pltpu


# ---------------------------------------------------------------------------
# Kernel 1: batched linear projections  qp = q @ Wq,  kp = k @ Wk
# (one MXU pass over all B*Q / B*K rows instead of per-batch tiny matmuls)
# ---------------------------------------------------------------------------
def _projection_kernel(q_ref, k_ref, wq_ref, wk_ref, qp_ref, kp_ref):
    qp_ref[...] = jnp.dot(q_ref[...], wq_ref[...],
                          preferred_element_type=jnp.float32).astype(qp_ref.dtype)
    kp_ref[...] = jnp.dot(k_ref[...], wk_ref[...],
                          preferred_element_type=jnp.float32).astype(kp_ref.dtype)


def _project(q2d, k2d, wq, wk, out_dtype):
    BQ, Dq = q2d.shape
    BK, Dk = k2d.shape
    H = wq.shape[1]
    return pl.pallas_call(
        _projection_kernel,
        out_shape=(jax.ShapeDtypeStruct((BQ, H), out_dtype),
                   jax.ShapeDtypeStruct((BK, H), out_dtype)),
        grid=(1,),
        in_specs=[pl.BlockSpec((BQ, Dq), lambda i: (0, 0)),
                  pl.BlockSpec((BK, Dk), lambda i: (0, 0)),
                  pl.BlockSpec((Dq, H), lambda i: (0, 0)),
                  pl.BlockSpec((Dk, H), lambda i: (0, 0))],
        out_specs=(pl.BlockSpec((BQ, H), lambda i: (0, 0)),
                   pl.BlockSpec((BK, H), lambda i: (0, 0))),
    )(q2d, k2d, wq, wk)


# ---------------------------------------------------------------------------
# Kernel 2: additive attention with flash-style online softmax over K tiles.
# ---------------------------------------------------------------------------
def _attn_kernel(vl_ref,                    # scalar prefetch: (B,) int32 in SMEM
                 qp_ref, kp_ref, v_ref, wv_ref,
                 out_ref,
                 m_sc, l_sc, acc_sc, *, tk):
    b = pl.program_id(0)
    kt = pl.program_id(2)
    n_kt = pl.num_programs(2)

    @pl.when(kt == 0)
    def _init():
        m_sc[...] = jnp.full_like(m_sc, -jnp.inf)
        l_sc[...] = jnp.zeros_like(l_sc)
        acc_sc[...] = jnp.zeros_like(acc_sc)

    vl = vl_ref[b]
    k_start = kt * tk

    # Skip fully-masked K tiles (their softmax contribution is exactly 0).
    # Exception: vl == 0 reproduces the reference semantics of a uniform
    # softmax over the -1e6-masked scores.
    @pl.when(jnp.logical_or(k_start < vl, vl == 0))
    def _compute():
        qp = qp_ref[0]                      # (Tq, H)
        kp = kp_ref[0]                      # (Tk, H)
        wv = wv_ref[...]                    # (1, H) row vector

        # features = tanh(qp[:, None, :] + kp[None, :, :])  -> EUP tanh stream
        feats = jnp.tanh(qp[:, None, :] + kp[None, :, :])          # (Tq, Tk, H)

        # scores = <feats, w_v> along H: VPU multiply + XLU reduce, instead of
        # a width-1 MXU matmul.
        scores = jnp.sum((feats * wv).astype(jnp.float32), axis=-1)  # (Tq, Tk)

        col = k_start + lax.broadcasted_iota(jnp.int32, scores.shape, 1)
        scores = jnp.where(col < vl, scores, jnp.float32(-1e6))

        m_prev = m_sc[...]                                           # (Tq, 1)
        m_new = jnp.maximum(m_prev, jnp.max(scores, axis=-1, keepdims=True))
        alpha = jnp.exp(m_prev - m_new)
        p = jnp.exp(scores - m_new)                                  # (Tq, Tk)
        l_sc[...] = alpha * l_sc[...] + jnp.sum(p, axis=-1, keepdims=True)
        acc_sc[...] = alpha * acc_sc[...] + jnp.dot(
            p.astype(v_ref.dtype), v_ref[0],
            preferred_element_type=jnp.float32)
        m_sc[...] = m_new

    @pl.when(kt == n_kt - 1)
    def _finalize():
        # dropout(attention_weights) is identity at eval time.
        # TODO(synk): train-mode dropout on the attention weights not implemented.
        out_ref[0] = (acc_sc[...] *
                      pl.reciprocal(l_sc[...], approx=False)).astype(out_ref.dtype)


def additive_attention(queries, keys, values, valid_lens, Wq, Wk, wv,
                       *, compute_dtype=jnp.float32, tq=None, tk=None):
    """Additive attention forward.

    queries (B,Q,Dq), keys (B,K,Dk), values (B,K,Dv), valid_lens (B,) int,
    Wq (Dq,H), Wk (Dk,H) (pre-transposed nn.Linear weights), wv (1,H).
    compute_dtype: jnp.float32 (exact) or jnp.bfloat16 (v6e/v7x fast path for
    the matmul inputs and the tanh/feats stream; accumulation stays f32).
    Returns (B, Q, Dv) float32.
    """
    B, Q, Dq = queries.shape
    _, K, Dk = keys.shape
    _, _, Dv = values.shape
    H = Wq.shape[1]
    assert wv.shape == (1, H)

    cd = compute_dtype

    # ---- batched projections: one MXU pass over all B*Q / B*K rows ---------
    qp, kp = _project(queries.reshape(B * Q, Dq).astype(cd),
                      keys.reshape(B * K, Dk).astype(cd),
                      Wq.astype(cd), Wk.astype(cd), cd)
    qp = qp.reshape(B, Q, H)
    kp = kp.reshape(B, K, H)

    # ---- lane-dense output: pad Dv up to a multiple of 128 (unmasked vst) --
    dv_pad = ((Dv + 127) // 128) * 128
    values_p = values if dv_pad == Dv else jnp.pad(
        values, ((0, 0), (0, 0), (0, dv_pad - Dv)))

    # ---- Q / K tiling (online softmax over the K axis) ---------------------
    tq = Q if tq is None else tq
    tk = K if tk is None else tk
    assert Q % tq == 0 and K % tk == 0, "Q/K must be divisible by tile sizes"
    n_qt, n_kt = Q // tq, K // tk

    valid_lens = valid_lens.astype(jnp.int32)

    grid_spec = pltpu.PrefetchScalarGridSpec(
        num_scalar_prefetch=1,
        grid=(B, n_qt, n_kt),
        in_specs=[
            pl.BlockSpec((1, tq, H), lambda b, qt, kt, vl: (b, qt, 0)),
            pl.BlockSpec((1, tk, H), lambda b, qt, kt, vl: (b, kt, 0)),
            pl.BlockSpec((1, tk, dv_pad), lambda b, qt, kt, vl: (b, kt, 0)),
            pl.BlockSpec((1, H), lambda b, qt, kt, vl: (0, 0)),
        ],
        out_specs=pl.BlockSpec((1, tq, dv_pad), lambda b, qt, kt, vl: (b, qt, 0)),
        scratch_shapes=[pltpu.VMEM((tq, 1), jnp.float32),      # m (running max)
                        pltpu.VMEM((tq, 1), jnp.float32),      # l (running sum)
                        pltpu.VMEM((tq, dv_pad), jnp.float32)],  # acc
    )

    out = pl.pallas_call(
        functools.partial(_attn_kernel, tk=tk),
        out_shape=jax.ShapeDtypeStruct((B, Q, dv_pad), jnp.float32),
        grid_spec=grid_spec,
        compiler_params=pltpu.CompilerParams(
            dimension_semantics=("parallel", "parallel", "arbitrary")),
    )(valid_lens, qp, kp, values_p, wv.astype(cd))

    return out[..., :Dv]


# ---------------------------------------------------------------------------
# Pure-JAX reference (mirrors the PyTorch module at eval time).
# ---------------------------------------------------------------------------
def _reference(queries, keys, values, valid_lens, Wq, Wk, wv):
    qp = queries @ Wq                                   # (B, Q, H)
    kp = keys @ Wk                                      # (B, K, H)
    feats = jnp.tanh(qp[:, :, None, :] + kp[:, None, :, :])
    scores = jnp.einsum('bqkh,h->bqk', feats, wv[0])    # (B, Q, K)
    col = jnp.arange(scores.shape[-1])[None, None, :]
    mask = col < valid_lens[:, None, None]
    scores = jnp.where(mask, scores, -1e6)
    attn = jax.nn.softmax(scores, axis=-1)
    return attn @ values


if __name__ == "__main__":
    # Small, module-consistent shapes.
    B, Q, K = 2, 4, 8
    query_size, key_size, num_hiddens, value_dim = 16, 12, 32, 6

    key = jax.random.PRNGKey(0)
    kq, kk, kv, kwq, kwk, kwv = jax.random.split(key, 6)

    queries = jax.random.normal(kq, (B, Q, query_size), dtype=jnp.float32)
    keys = jax.random.normal(kk, (B, K, key_size), dtype=jnp.float32)
    values = jax.random.normal(kv, (B, K, value_dim), dtype=jnp.float32)
    valid_lens = jnp.array([3, 6], dtype=jnp.int32)

    # Deterministic Linear-style init (uniform(-1/sqrt(fan_in), 1/sqrt(fan_in))).
    def linear_w(k, fan_in, fan_out):
        bound = 1.0 / (fan_in ** 0.5)
        return jax.random.uniform(k, (fan_in, fan_out), jnp.float32, -bound, bound)

    Wq = linear_w(kwq, query_size, num_hiddens)          # (Dq, H)  == W_q.T
    Wk = linear_w(kwk, key_size, num_hiddens)            # (Dk, H)  == W_k.T
    wv = linear_w(kwv, num_hiddens, 1).T                 # (1, H)   == w_v (native)

    ref = _reference(queries, keys, values, valid_lens, Wq, Wk, wv)

    # f32 path (exact).
    out = additive_attention(queries, keys, values, valid_lens, Wq, Wk, wv,
                             compute_dtype=jnp.float32)
    out = jax.block_until_ready(out)
    assert out.shape == (B, Q, value_dim)
    assert bool(jnp.allclose(out, ref, atol=5e-5, rtol=5e-5)), \
        "f32 kernel mismatch vs reference"

    # bf16 compute path (v6e/v7x fast path) — looser tolerance.
    out_bf16 = additive_attention(queries, keys, values, valid_lens, Wq, Wk, wv,
                                  compute_dtype=jnp.bfloat16)
    out_bf16 = jax.block_until_ready(out_bf16)
    assert bool(jnp.allclose(out_bf16, ref, atol=1e-1, rtol=1e-1)), \
        "bf16 kernel mismatch vs reference"

    print("KERNEL_OK")
</pallas_src>

<mosaic_0001>
module attributes {stable_mosaic.version = 11 : i64} {
  func.func @_projection_kernel(%arg0: i32, %arg1: memref<8x16xf32, #tpu.memory_space<vmem>>, %arg2: memref<16x12xf32, #tpu.memory_space<vmem>>, %arg3: memref<16x32xf32, #tpu.memory_space<vmem>>, %arg4: memref<12x32xf32, #tpu.memory_space<vmem>>, %arg5: memref<8x32xf32, #tpu.memory_space<vmem>>, %arg6: memref<16x32xf32, #tpu.memory_space<vmem>>) attributes {dimension_semantics = [#tpu.dimension_semantics<arbitrary>], iteration_bounds = array<i64: 1>, scalar_prefetch = 0 : i64, scratch_operands = 0 : i64, tpu.core_type = #tpu.core_type<tc>, window_params = [{pipeline_mode = #tpu.pipeline_mode<synchronous>, transform_indices = @transform_0, window_bounds = array<i64: 8, 16>}, {pipeline_mode = #tpu.pipeline_mode<synchronous>, transform_indices = @transform_1, window_bounds = array<i64: 16, 12>}, {pipeline_mode = #tpu.pipeline_mode<synchronous>, transform_indices = @transform_2, window_bounds = array<i64: 16, 32>}, {pipeline_mode = #tpu.pipeline_mode<synchronous>, transform_indices = @transform_3, window_bounds = array<i64: 12, 32>}, {pipeline_mode = #tpu.pipeline_mode<synchronous>, transform_indices = @transform_4, window_bounds = array<i64: 8, 32>}, {pipeline_mode = #tpu.pipeline_mode<synchronous>, transform_indices = @transform_5, window_bounds = array<i64: 16, 32>}]} {
    %c0 = arith.constant 0 : index
    %c0_0 = arith.constant 0 : index
    %0 = vector.load %arg1[%c0, %c0_0] : memref<8x16xf32, #tpu.memory_space<vmem>>, vector<8x16xf32>
    %c0_1 = arith.constant 0 : index
    %c0_2 = arith.constant 0 : index
    %1 = vector.load %arg3[%c0_1, %c0_2] : memref<16x32xf32, #tpu.memory_space<vmem>>, vector<16x32xf32>
    %cst = arith.constant dense<0.000000e+00> : vector<8x32xf32>
    %2 = tpu.matmul %0, %1, %cst {dimension_numbers = #tpu.dot_dimension_numbers<[1], [0], [0], [1], [0, 0, 1, 1], [], []>} : vector<8x16xf32>, vector<16x32xf32>, vector<8x32xf32> -> vector<8x32xf32>
    %c0_3 = arith.constant 0 : index
    %c0_4 = arith.constant 0 : index
    %3 = vector.load %arg5[%c0_3, %c0_4] : memref<8x32xf32, #tpu.memory_space<vmem>>, vector<8x32xf32>
    tpu.vector_store %arg5[%c0_3, %c0_4], %2 {strides = array<i32>} : memref<8x32xf32, #tpu.memory_space<vmem>>, vector<8x32xf32>,
    %c0_5 = arith.constant 0 : index
    %c0_6 = arith.constant 0 : index
    %4 = vector.load %arg2[%c0_5, %c0_6] : memref<16x12xf32, #tpu.memory_space<vmem>>, vector<16x12xf32>
    %c0_7 = arith.constant 0 : index
    %c0_8 = arith.constant 0 : index
    %5 = vector.load %arg4[%c0_7, %c0_8] : memref<12x32xf32, #tpu.memory_space<vmem>>, vector<12x32xf32>
    %cst_9 = arith.constant dense<0.000000e+00> : vector<16x32xf32>
    %6 = tpu.matmul %4, %5, %cst_9 {dimension_numbers = #tpu.dot_dimension_numbers<[1], [0], [0], [1], [0, 0, 1, 1], [], []>} : vector<16x12xf32>, vector<12x32xf32>, vector<16x32xf32> -> vector<16x32xf32>
    %c0_10 = arith.constant 0 : index
    %c0_11 = arith.constant 0 : index
    %7 = vector.load %arg6[%c0_10, %c0_11] : memref<16x32xf32, #tpu.memory_space<vmem>>, vector<16x32xf32>
    tpu.vector_store %arg6[%c0_10, %c0_11], %6 {strides = array<i32>} : memref<16x32xf32, #tpu.memory_space<vmem>>, vector<16x32xf32>,
    return
  }
  func.func @transform_0(%arg0: i32) -> (i32, i32) {
    %c0_i32 = arith.constant 0 : i32
    %c0_i32_0 = arith.constant 0 : i32
    %c0_i32_1 = arith.constant 0 : i32
    return %c0_i32, %c0_i32_0 : i32, i32
  }
  func.func @transform_1(%arg0: i32) -> (i32, i32) {
    %c0_i32 = arith.constant 0 : i32
    %c0_i32_0 = arith.constant 0 : i32
    %c0_i32_1 = arith.constant 0 : i32
    return %c0_i32, %c0_i32_0 : i32, i32
  }
  func.func @transform_2(%arg0: i32) -> (i32, i32) {
    %c0_i32 = arith.constant 0 : i32
    %c0_i32_0 = arith.constant 0 : i32
    %c0_i32_1 = arith.constant 0 : i32
    return %c0_i32, %c0_i32_0 : i32, i32
  }
  func.func @transform_3(%arg0: i32) -> (i32, i32) {
    %c0_i32 = arith.constant 0 : i32
    %c0_i32_0 = arith.constant 0 : i32
    %c0_i32_1 = arith.constant 0 : i32
    return %c0_i32, %c0_i32_0 : i32, i32
  }
  func.func @transform_4(%arg0: i32) -> (i32, i32) {
    %c0_i32 = arith.constant 0 : i32
    %c0_i32_0 = arith.constant 0 : i32
    %c0_i32_1 = arith.constant 0 : i32
    return %c0_i32, %c0_i32_0 : i32, i32
  }
  func.func @transform_5(%arg0: i32) -> (i32, i32) {
    %c0_i32 = arith.constant 0 : i32
    %c0_i32_0 = arith.constant 0 : i32
    %c0_i32_1 = arith.constant 0 : i32
    return %c0_i32, %c0_i32_0 : i32, i32
  }
}

</mosaic_0001>

<bundles_post_ra>
// kernel: tpu_custom_call.1
= control target key start
LH: loop header
LB: loop body
LE: loop exit
PB: predicated region body
PF: predicated region fallthrough
CT: control target
= control target key end

     0   :  { %11 = vsyncpa [#allocation3], 0  ;;  %s601_s0 = inlined_call_operand.hbm [shape: f32[8,16], index: 0, kind: input, shape index: {}]   ;;  %s602_s1 = inlined_call_operand.hbm [shape: f32[16,12], index: 1, kind: input, shape index: {}]   ;;  %s603_s2 = inlined_call_operand.hbm [shape: f32[16,32], index: 2, kind: input, shape index: {}]   ;;  %s604_s3 = inlined_call_operand.hbm [shape: f32[12,32], index: 3, kind: input, shape index: {}]   ;;  %s605_s4 = inlined_call_operand.hbm [shape: f32[8,32], index: 4, kind: output, shape index: {0}]   ;;  %s606_s5 = inlined_call_operand.hbm [shape: f32[16,32], index: 5, kind: output, shape index: {1}]  }
   0x1   :  { %12 = vsyncpa [#allocation6], 0 }
   0x2   :  { %13 = vsyncpa [#allocation9], 0 }
   0x3   :  { %14 = vsyncpa [#allocation4], 0 }
   0x4   :  { %15 = vsyncpa [#allocation12], 0  ;;  %s466_s18 = smov [#allocation5]   ;;  %s324_s22 = scalar_lea.hbm %s602_s1, 256 }
   0x5   :  { %s31_s19 = sshll.u32 %s466_s18, 4  ;;  %p325_p0 = scmp.ne.s32.totalorder %s602_s1, %s324_s22  ;;  %s32_s19 = int_to_ptr.vmem [resolvable:$true] %s31_s19 }
   0x6   :  { %p328_p1 = scmp.lt.u32.totalorder %s324_s22, %s602_s1 }
   0x8   :  { %p330_p2 = pnand %p328_p1, %p325_p0 }
   0xa   :  { %333 = shalt.err (!%p330_p2)
}
   0xb   :  { %s334_s27 = scalar_lea.vmem %s32_s19, 256  ;;  %p339_p4 = scmp.lt.s32.totalorder %s32_s19, %s32_s19 }
   0xc   :  { %p335_p3 = scmp.ne.s32.totalorder %s32_s19, %s334_s27  ;;  %p340_p5 = scmp.lt.s32.totalorder %s334_s27, %s334_s27 }
   0xe   :  { %p341_p6 = por %p340_p5, %p339_p4 }
  0x10   :  { %p342_p7 = pnand %p341_p6, %p335_p3 }
  0x12   :  { %345 = shalt.err (!%p342_p7)
}
  0x13   :  { %s467_s28 = smov 128   ;;  %s468_s29 = smov 8  }
  0x14   :  { %37 = dma.hbm_to_vmem [thread:$0]  %s602_s1, 256, %s32_s19, [#allocation6], %s467_s28, %s467_s28, %s468_s29  }
  0x15   :  { %s469_s7 = smov [#allocation2]   ;;  %s470_s9 = smov [#allocation7]  }
  0x16   :  { %s22_s8 = sshll.u32 %s469_s7, 4  ;;  %s43_s10 = sshll.u32 %s470_s9, 4  ;;  %s23_s8 = int_to_ptr.vmem [resolvable:$true] %s22_s8  ;;  %s44_s10 = int_to_ptr.vmem [resolvable:$true] %s43_s10 }
  0x17   :  { %s346_s13 = scalar_lea.hbm %s601_s0, 128 }
  0x18   :  { %p347_p8 = scmp.ne.s32.totalorder %s601_s0, %s346_s13  ;;  %p350_p9 = scmp.lt.u32.totalorder %s346_s13, %s601_s0 }
  0x1a   :  { %p352_p10 = pnand %p350_p9, %p347_p8 }
  0x1c   :  { %355 = shalt.err (!%p352_p10)
}
  0x1d   :  { %s356_s1 = scalar_lea.vmem %s23_s8, 128  ;;  %p361_p12 = scmp.lt.s32.totalorder %s23_s8, %s23_s8 }
  0x1e   :  { %p357_p11 = scmp.ne.s32.totalorder %s23_s8, %s356_s1  ;;  %p362_p13 = scmp.lt.s32.totalorder %s356_s1, %s356_s1 }
  0x20   :  { %p363_p0 = por %p362_p13, %p361_p12 }
  0x22   :  { %p364_p1 = pnand %p363_p0, %p357_p11 }
  0x24   :  { %367 = shalt.err (!%p364_p1)
}
  0x25   :  { %25 = dma.hbm_to_vmem [thread:$0]  %s601_s0, 128, %s23_s8, [#allocation3]  }
  0x26   :  { %s368_s22 = scalar_lea.hbm %s603_s2, 256 }
  0x27   :  { %p369_p2 = scmp.ne.s32.totalorder %s603_s2, %s368_s22  ;;  %p372_p3 = scmp.lt.u32.totalorder %s368_s22, %s603_s2 }
  0x29   :  { %p374_p4 = pnand %p372_p3, %p369_p2 }
  0x2b   :  { %377 = shalt.err (!%p374_p4)
}
  0x2c   :  { %s378_s27 = scalar_lea.vmem %s44_s10, 256  ;;  %p383_p6 = scmp.lt.s32.totalorder %s44_s10, %s44_s10 }
  0x2d   :  { %p379_p5 = scmp.ne.s32.totalorder %s44_s10, %s378_s27  ;;  %p384_p7 = scmp.lt.s32.totalorder %s378_s27, %s378_s27 }
  0x2f   :  { %p385_p8 = por %p384_p7, %p383_p6 }
  0x31   :  { %p386_p9 = pnand %p385_p8, %p379_p5 }
  0x33   :  { %389 = shalt.err (!%p386_p9)
}
  0x34   :  { %49 = dma.hbm_to_vmem [thread:$0]  %s603_s2, 256, %s44_s10, [#allocation6], %s467_s28, %s467_s28, %s468_s29  }
  0x35   :  { %s471_s6 = smov [#allocation8]   ;;  %s390_s11 = scalar_lea.hbm %s604_s3, 256 }
  0x36   :  { %s55_s7 = sshll.u32 %s471_s6, 4  ;;  %p391_p10 = scmp.ne.s32.totalorder %s604_s3, %s390_s11  ;;  %s56_s7 = int_to_ptr.vmem [resolvable:$true] %s55_s7 }
  0x37   :  { %p394_p11 = scmp.lt.u32.totalorder %s390_s11, %s604_s3 }
  0x39   :  { %p396_p12 = pnand %p394_p11, %p391_p10 }
  0x3b   :  { %399 = shalt.err (!%p396_p12)
}
  0x3c   :  { %s400_s16 = scalar_lea.vmem %s56_s7, 256  ;;  %p405_p0 = scmp.lt.s32.totalorder %s56_s7, %s56_s7 }
  0x3d   :  { %p401_p13 = scmp.ne.s32.totalorder %s56_s7, %s400_s16  ;;  %p406_p1 = scmp.lt.s32.totalorder %s400_s16, %s400_s16 }
  0x3f   :  { %p407_p2 = por %p406_p1, %p405_p0 }
  0x41   :  { %p408_p3 = pnand %p407_p2, %p401_p13 }
  0x43   :  { %411 = shalt.err (!%p408_p3)
}
  0x44   :  { %61 = dma.hbm_to_vmem [thread:$0]  %s604_s3, 256, %s56_s7, [#allocation9], %s467_s28, %s467_s28, %s468_s29  }
  0x45   :  { %456 = dma.done.wait [#allocation3], 128  }
  0x46   :  { %457 = vsyncadd [#allocation3], 4294967168 }
  0x47   :  { %458 = dma.done.wait [#allocation6], 512  }
  0x48   :  { %459 = vsyncadd [#allocation6], 4294966784 }
  0x49   :  { %460 = dma.done.wait [#allocation9], 256  }
  0x4a   :  { %461 = vsyncadd [#allocation9], 4294967040  ;;  %v472_v0 = vmov 0.0|0.0   ;;  %vm473_vm0 = vmmov 0   ;;  %v474_v1 = vmov 0.0   ;;  %vm164_vm1 = vcmask 1043456  }
  0x4b   :  { %303 = vmatprep.subr.bf16.mxu0 %v472_v0  ;;  %293 = vmatprep.mubr.msk.f32.mxu0 %vm473_vm0, %v474_v1  ;;  %vm475_vm2 = vmmov 1   ;;  %vm157_vm4 = vcmask 97280   ;;  %v155_v2 = vld [vmem:[#allocation8] sm:$0xff]  ;;  %v156_v3 = vld [vmem:[#allocation8 + $0x8] sm:$0xf]  ;;  %v75_v4 = vld [vmem:[#allocation7] sm:$0xff] }
  0x4c   :  { %vm307_vm3 = vmpackc.low %vm164_vm1, %vm475_vm2  ;;  %v306_v5 = vpack.c.bf16 %v156_v3, %v155_v2  ;;  %v76_v6 = vld [vmem:[#allocation7 + $0x8] sm:$0xff]  ;;  %v153_v7 = vld [vmem:[#allocation5] sm:$0xff]  ;;  %vm77_vm5 = vcmask 130048   ;;  %s476_s3 = smov [#allocation10]   ;;  %s477_s1 = smov [#allocation11]   ;;  %vm151_vm6 = vcmask 261120  }
  0x4d   :  { %v304_v8 = vpack.c.bf16 %v76_v6, %v75_v4  ;;  %300 = vmatprep.mubr.msk.f32.mxu1 %vm157_vm4, %v153_v7  ;;  %v74_v9 = vld [vmem:[#allocation2] sm:$0xff]  ;;  %v154_v10 = vld [vmem:[#allocation5 + $0x8] sm:$0xff]  ;;  %s251_s17 = sshll.u32 %s476_s3, 4  ;;  %s260_s18 = sshll.u32 %s477_s1, 4  ;;  %s252_s17 = int_to_ptr.vmem [resolvable:$true] %s251_s17  ;;  %s567_s18 = int_to_ptr.vmem [resolvable:$true] %s260_s18 }
  0x4e   :  { %308 = vmatprep.subr.msk.bf16.mxu1 %vm307_vm3, %v306_v5  ;;  %s412_s19 = scalar_lea.vmem %s252_s17, 128  ;;  %p417_p5 = scmp.lt.s32.totalorder %s252_s17, %s252_s17 }
  0x4f   :  { %305 = vmatpush3.bf16.msra.mxu0 %v304_v8  ;;  %311 = vmatpush3.bf16.msk.msra.mxu1 %vm307_vm3, %v306_v5  ;;  %p413_p4 = scmp.ne.s32.totalorder %s252_s17, %s412_s19  ;;  %p418_p6 = scmp.lt.s32.totalorder %s412_s19, %s412_s19 }
  0x51   :  { %p419_p7 = por %p418_p6, %p417_p5 }
  0x52   :  { %294 = vmatmul.mubr.msk.f32.vlgmr.msra.gmra.mrb[0].mxu0 %vm77_vm5, %v74_v9  ;;  %301 = vmatmul.mubr.msk.f32.vlgmr.msra.gmra.mrb[0].mxu1 %vm157_vm4, %v154_v10 }
  0x53   :  { %p420_p8 = pnand %p419_p7, %p413_p4 }
 0x125   :  { %v147_v11 = vpop.f32.mrb[0].mxu0  ;;  %v302_v12 = vpop.f32.mrb[0].mxu1 }
 0x126   :  { %244 = vst.msk [vmem:[#allocation11 + $0x8] sm:$0xff] %vm151_vm6, %v302_v12  ;;  %152 = vst.msk [vmem:[#allocation10] sm:$0xff] %vm151_vm6, %v147_v11  ;;  %v295_v13 = vpop.f32.mrb[1].mxu0  ;;  %v234_v14 = vpop.f32.mrb[1].mxu1 }
 0x127   :  { %243 = vst.msk [vmem:[#allocation11] sm:$0xff] %vm151_vm6, %v234_v14 }
 0x128   :  { %423 = shalt.err (!%p420_p8)
}
 0x129   :  { %s424_s22 = scalar_lea.hbm %s605_s4, 128 }
 0x12a   :  { %p425_p9 = scmp.ne.s32.totalorder %s605_s4, %s424_s22  ;;  %p428_p10 = scmp.lt.u32.totalorder %s424_s22, %s605_s4 }
 0x12c   :  { %p430_p11 = pnand %p428_p10, %p425_p9 }
 0x12e   :  { %433 = shalt.err (!%p430_p11)
}
 0x12f   :  { %254 = dma.vmem_to_hbm [thread:$0]  %s252_s17, 128, %s605_s4, [#allocation4]  }
 0x130   :  { %s434_s30 = scalar_lea.vmem %s567_s18, 256  ;;  %p439_p13 = scmp.lt.s32.totalorder %s567_s18, %s567_s18 }
 0x131   :  { %p435_p12 = scmp.ne.s32.totalorder %s567_s18, %s434_s30  ;;  %p440_p0 = scmp.lt.s32.totalorder %s434_s30, %s434_s30 }
 0x133   :  { %p441_p1 = por %p440_p0, %p439_p13 }
 0x135   :  { %p442_p2 = pnand %p441_p1, %p435_p12 }
 0x137   :  { %445 = shalt.err (!%p442_p2)
}
 0x138   :  { %s446_s8 = scalar_lea.hbm %s606_s5, 256 }
 0x139   :  { %p447_p3 = scmp.ne.s32.totalorder %s606_s5, %s446_s8  ;;  %p450_p4 = scmp.lt.u32.totalorder %s446_s8, %s606_s5 }
 0x13b   :  { %p452_p5 = pnand %p450_p4, %p447_p3 }
 0x13d   :  { %455 = shalt.err (!%p452_p5)
}
 0x13e   :  { %266 = dma.vmem_to_hbm [thread:$0]  %s567_s18, 256, %s606_s5, [#allocation12], %s467_s28, %s467_s28, %s468_s29  }
 0x13f   :  { %462 = dma.done.wait [#allocation4], 128  }
 0x140   :  { %463 = vsyncadd [#allocation4], 4294967168 }
 0x141   :  { %464 = dma.done.wait [#allocation12], 256  }
 0x142   :  { %465 = vsyncadd [#allocation12], 4294967040 }
 0x143   :  { %273 = vsyncpa [#allocation3], 1 }
 0x144   :  { %274 = vsyncpa [#allocation6], 1 }
 0x145   :  { %275 = vsyncpa [#allocation9], 1 }
 0x146   :  { %276 = vsyncpa [#allocation4], 1 }
 0x147   :  { %277 = vsyncpa [#allocation12], 1 }

</bundles_post_ra>
